<compile_context>
chip_gen: v7x
topology: tpu7x:2x2x1
jax: 0.10.0
libtpu: 0.0.40
codegen_flags: <defaults>
</compile_context>

<pallas_src>
import functools

import jax
import jax.numpy as jnp
from jax.experimental import pallas as pl
from jax.experimental.pallas import tpu as pltpu


def ffn_kernel(x_ref, w1_ref, b1_ref, w2_ref, b2_ref, gamma_ref, beta_ref,
               out_ref):
    x = x_ref[...]                                            # (TM, d_in), input dtype

    # w_1 + ReLU  (MXU matmul in operand dtype, f32 accumulate)
    h = jnp.dot(x, w1_ref[...], preferred_element_type=jnp.float32)
    h = h + b1_ref[...].astype(jnp.float32)                   # (TM, d_hid)
    h = jnp.maximum(h, 0.0)

    # w_2 (cast h back to weight dtype so bf16 weights hit the fast MXU path)
    y = jnp.dot(h.astype(w2_ref.dtype), w2_ref[...],
                preferred_element_type=jnp.float32)
    y = y + b2_ref[...].astype(jnp.float32)                   # (TM, d_in)

    # dropout (eval) = identity, then residual add (f32)
    y = y + x.astype(jnp.float32)

    # LayerNorm over feature axis (biased variance, eps = 1e-6), f32 path
    mean = jnp.mean(y, axis=-1, keepdims=True)
    centered = y - mean
    var = jnp.mean(centered * centered, axis=-1, keepdims=True)
    inv = jax.lax.rsqrt(var + 1e-6)
    out = centered * inv * gamma_ref[...].astype(jnp.float32) \
          + beta_ref[...].astype(jnp.float32)

    out_ref[...] = out.astype(out_ref.dtype)


def _round_up(x, m):
    return ((x + m - 1) // m) * m


def _pick_block_m(M, d_in, d_hid, x_bytes, w_bytes, vmem_budget=48 << 20):
    """Largest token-tile that keeps resident weights + double-buffered tiles
    + f32 intermediates under a conservative VMEM budget (fits v7x's 64 MiB)."""
    weight_bytes = 2 * d_in * d_hid * w_bytes + (3 * d_in + d_hid) * w_bytes
    chosen = 128
    for tm in (1024, 768, 512, 384, 256, 128):
        io_tiles = 2 * 2 * tm * d_in * x_bytes          # x + out, double-buffered
        inter = tm * d_hid * 4 + 2 * tm * d_in * 4      # h, y intermediates (f32)
        if weight_bytes + io_tiles + inter <= vmem_budget:
            chosen = tm
            break
    # Don't make the tile (and hence padding) larger than the problem itself.
    return min(chosen, max(128, _round_up(M, 128)))


@functools.partial(jax.jit, static_argnames=("block_m",))
def positionwise_feed_forward(x, w1, b1, w2, b2, gamma, beta, *, block_m=None):
    """x: (B, S, d_in). Weights stored as (in, out) matrices (torch transposed)."""
    B, S, d_in = x.shape
    d_hid = w1.shape[1]
    M = B * S
    x2d = x.reshape(M, d_in)

    x_bytes = jnp.dtype(x.dtype).itemsize
    w_bytes = jnp.dtype(w1.dtype).itemsize
    if block_m is None:
        block_m = _pick_block_m(M, d_in, d_hid, x_bytes, w_bytes)

    # Pad the token axis so every grid step sees a full (block_m, d_in) tile;
    # padded rows are sliced off afterwards (LayerNorm is per-token, so the
    # padding never contaminates real outputs).
    M_pad = _round_up(M, block_m)
    if M_pad != M:
        x2d = jnp.pad(x2d, ((0, M_pad - M), (0, 0)))
    grid = (M_pad // block_m,)

    # Explicit VMEM budget: resident weights + double-buffered x/out tiles +
    # f32 intermediates, with headroom.  Avoids the default-scoped-VMEM cliff.
    weight_bytes = 2 * d_in * d_hid * w_bytes + (3 * d_in + d_hid) * w_bytes
    io_tiles = 2 * 2 * block_m * d_in * x_bytes
    inter = block_m * d_hid * 4 + 2 * block_m * d_in * 4
    vmem_limit = int((weight_bytes + io_tiles + inter) * 3 // 2) + (4 << 20)
    vmem_limit = max(16 << 20, min(vmem_limit, 100 << 20))

    cost = pl.CostEstimate(
        flops=4 * M_pad * d_in * d_hid,                 # two matmuls
        transcendentals=M_pad,                          # rsqrt per token
        bytes_accessed=2 * M_pad * d_in * x_bytes + weight_bytes,
    )

    out2d = pl.pallas_call(
        ffn_kernel,
        out_shape=jax.ShapeDtypeStruct((M_pad, d_in), x.dtype),
        grid_spec=pltpu.PrefetchScalarGridSpec(
            num_scalar_prefetch=0,
            grid=grid,
            in_specs=[
                pl.BlockSpec((block_m, d_in), lambda i: (i, 0)),  # x tile (pipelined)
                pl.BlockSpec((d_in, d_hid), lambda i: (0, 0)),    # W1 (resident)
                pl.BlockSpec((1, d_hid), lambda i: (0, 0)),       # b1
                pl.BlockSpec((d_hid, d_in), lambda i: (0, 0)),    # W2 (resident)
                pl.BlockSpec((1, d_in), lambda i: (0, 0)),        # b2
                pl.BlockSpec((1, d_in), lambda i: (0, 0)),        # gamma
                pl.BlockSpec((1, d_in), lambda i: (0, 0)),        # beta
            ],
            out_specs=pl.BlockSpec((block_m, d_in), lambda i: (i, 0)),
        ),
        compiler_params=pltpu.CompilerParams(
            dimension_semantics=("parallel",),   # token tiles independent -> 2 TCs on v7x
            vmem_limit_bytes=vmem_limit,
        ),
        cost_estimate=cost,
    )(x2d, w1, b1, w2, b2, gamma, beta)

    return out2d[:M].reshape(B, S, d_in)


def _init_params(key, d_in, d_hid, dtype=jnp.float32):
    """Deterministic init mimicking torch.nn.Linear / LayerNorm shapes."""
    k1, k2, k3, k4 = jax.random.split(key, 4)
    bound1 = 1.0 / jnp.sqrt(d_in)
    bound2 = 1.0 / jnp.sqrt(d_hid)
    # Stored transposed relative to torch (torch: (out, in); here: (in, out)).
    w1 = jax.random.uniform(k1, (d_in, d_hid), dtype, -bound1, bound1)
    b1 = jax.random.uniform(k2, (1, d_hid), dtype, -bound1, bound1)
    w2 = jax.random.uniform(k3, (d_hid, d_in), dtype, -bound2, bound2)
    b2 = jax.random.uniform(k4, (1, d_in), dtype, -bound2, bound2)
    gamma = jnp.ones((1, d_in), dtype)
    beta = jnp.zeros((1, d_in), dtype)
    return w1, b1, w2, b2, gamma, beta


if __name__ == "__main__":
    # Small but lane/MXU-aligned demo shapes (feature dims multiples of 128).
    B, S, d_in, d_hid = 2, 128, 128, 256
    key = jax.random.PRNGKey(0)
    kx, kp = jax.random.split(key)
    x = jax.random.normal(kx, (B, S, d_in), jnp.float32)
    params = _init_params(kp, d_in, d_hid)

    # block_m=128 -> grid of 2 token tiles, exercising the pipelined path.
    out = positionwise_feed_forward(x, *params, block_m=128)
    jax.block_until_ready(out)

    # Pure-JAX reference check (same math) for sanity.
    w1, b1, w2, b2, gamma, beta = params
    h = jnp.maximum(x @ w1 + b1, 0.0)
    y = h @ w2 + b2 + x
    mean = y.mean(-1, keepdims=True)
    var = ((y - mean) ** 2).mean(-1, keepdims=True)
    ref = (y - mean) / jnp.sqrt(var + 1e-6) * gamma + beta
    assert jnp.allclose(out, ref, atol=1e-4, rtol=1e-4)

    print("KERNEL_OK")
</pallas_src>

<mosaic_0001>
module attributes {stable_mosaic.version = 11 : i64} {
  func.func @ffn_kernel(%arg0: i32, %arg1: memref<128x128xf32, #tpu.memory_space<vmem>>, %arg2: memref<128x256xf32, #tpu.memory_space<vmem>>, %arg3: memref<1x256xf32, #tpu.memory_space<vmem>>, %arg4: memref<256x128xf32, #tpu.memory_space<vmem>>, %arg5: memref<1x128xf32, #tpu.memory_space<vmem>>, %arg6: memref<1x128xf32, #tpu.memory_space<vmem>>, %arg7: memref<1x128xf32, #tpu.memory_space<vmem>>, %arg8: memref<128x128xf32, #tpu.memory_space<vmem>>) attributes {dimension_semantics = [#tpu.dimension_semantics<parallel>], iteration_bounds = array<i64: 2>, scalar_prefetch = 0 : i64, scratch_operands = 0 : i64, tpu.core_type = #tpu.core_type<tc>, window_params = [{transform_indices = @transform_0, window_bounds = array<i64: 128, 128>}, {pipeline_mode = #tpu.pipeline_mode<synchronous>, transform_indices = @transform_1, window_bounds = array<i64: 128, 256>}, {pipeline_mode = #tpu.pipeline_mode<synchronous>, transform_indices = @transform_2, window_bounds = array<i64: 1, 256>}, {pipeline_mode = #tpu.pipeline_mode<synchronous>, transform_indices = @transform_3, window_bounds = array<i64: 256, 128>}, {pipeline_mode = #tpu.pipeline_mode<synchronous>, transform_indices = @transform_4, window_bounds = array<i64: 1, 128>}, {pipeline_mode = #tpu.pipeline_mode<synchronous>, transform_indices = @transform_5, window_bounds = array<i64: 1, 128>}, {pipeline_mode = #tpu.pipeline_mode<synchronous>, transform_indices = @transform_6, window_bounds = array<i64: 1, 128>}, {transform_indices = @transform_7, window_bounds = array<i64: 128, 128>}]} {
    %c0 = arith.constant 0 : index
    %c0_0 = arith.constant 0 : index
    %0 = vector.load %arg1[%c0, %c0_0] : memref<128x128xf32, #tpu.memory_space<vmem>>, vector<128x128xf32>
    %c0_1 = arith.constant 0 : index
    %c0_2 = arith.constant 0 : index
    %1 = vector.load %arg2[%c0_1, %c0_2] : memref<128x256xf32, #tpu.memory_space<vmem>>, vector<128x256xf32>
    %cst = arith.constant dense<0.000000e+00> : vector<128x256xf32>
    %2 = tpu.matmul %0, %1, %cst {dimension_numbers = #tpu.dot_dimension_numbers<[1], [0], [0], [1], [0, 0, 1, 1], [], []>} : vector<128x128xf32>, vector<128x256xf32>, vector<128x256xf32> -> vector<128x256xf32>
    %c0_3 = arith.constant 0 : index
    %c0_4 = arith.constant 0 : index
    %3 = vector.load %arg3[%c0_3, %c0_4] : memref<1x256xf32, #tpu.memory_space<vmem>>, vector<1x256xf32>
    %4 = vector.broadcast %3 : vector<1x256xf32> to vector<128x256xf32>
    %5 = arith.addf %2, %4 : vector<128x256xf32>
    %cst_5 = arith.constant 0.000000e+00 : f32
    %6 = vector.broadcast %cst_5 : f32 to vector<128x256xf32>
    %7 = arith.maximumf %5, %6 : vector<128x256xf32>
    %c0_6 = arith.constant 0 : index
    %c0_7 = arith.constant 0 : index
    %8 = vector.load %arg4[%c0_6, %c0_7] : memref<256x128xf32, #tpu.memory_space<vmem>>, vector<256x128xf32>
    %cst_8 = arith.constant dense<0.000000e+00> : vector<128x128xf32>
    %9 = tpu.matmul %7, %8, %cst_8 {dimension_numbers = #tpu.dot_dimension_numbers<[1], [0], [0], [1], [0, 0, 1, 1], [], []>} : vector<128x256xf32>, vector<256x128xf32>, vector<128x128xf32> -> vector<128x128xf32>
    %c0_9 = arith.constant 0 : index
    %c0_10 = arith.constant 0 : index
    %10 = vector.load %arg5[%c0_9, %c0_10] : memref<1x128xf32, #tpu.memory_space<vmem>>, vector<1x128xf32>
    %11 = vector.broadcast %10 : vector<1x128xf32> to vector<128x128xf32>
    %12 = arith.addf %9, %11 : vector<128x128xf32>
    %13 = arith.addf %12, %0 : vector<128x128xf32>
    %cst_11 = arith.constant dense<0.000000e+00> : vector<128xf32>
    %14 = vector.multi_reduction <add>, %13, %cst_11 [1] : vector<128x128xf32> to vector<128xf32>
    %15 = vector.shape_cast %14 : vector<128xf32> to vector<128x1xf32>
    %cst_12 = arith.constant 1.280000e+02 : f32
    %16 = vector.broadcast %cst_12 : f32 to vector<128x1xf32>
    %17 = arith.divf %15, %16 : vector<128x1xf32>
    %18 = vector.broadcast %17 : vector<128x1xf32> to vector<128x128xf32>
    %19 = arith.subf %13, %18 : vector<128x128xf32>
    %20 = arith.mulf %19, %19 : vector<128x128xf32>
    %cst_13 = arith.constant dense<0.000000e+00> : vector<128xf32>
    %21 = vector.multi_reduction <add>, %20, %cst_13 [1] : vector<128x128xf32> to vector<128xf32>
    %22 = vector.shape_cast %21 : vector<128xf32> to vector<128x1xf32>
    %cst_14 = arith.constant 1.280000e+02 : f32
    %23 = vector.broadcast %cst_14 : f32 to vector<128x1xf32>
    %24 = arith.divf %22, %23 : vector<128x1xf32>
    %cst_15 = arith.constant 9.99999997E-7 : f32
    %25 = vector.broadcast %cst_15 : f32 to vector<128x1xf32>
    %26 = arith.addf %24, %25 : vector<128x1xf32>
    %27 = math.rsqrt %26 : vector<128x1xf32>
    %28 = vector.broadcast %27 : vector<128x1xf32> to vector<128x128xf32>
    %29 = arith.mulf %19, %28 : vector<128x128xf32>
    %c0_16 = arith.constant 0 : index
    %c0_17 = arith.constant 0 : index
    %30 = vector.load %arg6[%c0_16, %c0_17] : memref<1x128xf32, #tpu.memory_space<vmem>>, vector<1x128xf32>
    %31 = vector.broadcast %30 : vector<1x128xf32> to vector<128x128xf32>
    %32 = arith.mulf %29, %31 : vector<128x128xf32>
    %c0_18 = arith.constant 0 : index
    %c0_19 = arith.constant 0 : index
    %33 = vector.load %arg7[%c0_18, %c0_19] : memref<1x128xf32, #tpu.memory_space<vmem>>, vector<1x128xf32>
    %34 = vector.broadcast %33 : vector<1x128xf32> to vector<128x128xf32>
    %35 = arith.addf %32, %34 : vector<128x128xf32>
    %c0_20 = arith.constant 0 : index
    %c0_21 = arith.constant 0 : index
    %36 = vector.load %arg8[%c0_20, %c0_21] : memref<128x128xf32, #tpu.memory_space<vmem>>, vector<128x128xf32>
    tpu.vector_store %arg8[%c0_20, %c0_21], %35 {strides = array<i32>} : memref<128x128xf32, #tpu.memory_space<vmem>>, vector<128x128xf32>,
    return
  }
  func.func @transform_0(%arg0: i32) -> (i32, i32) {
    %c0_i32 = arith.constant 0 : i32
    %c0_i32_0 = arith.constant 0 : i32
    return %arg0, %c0_i32 : i32, i32
  }
  func.func @transform_1(%arg0: i32) -> (i32, i32) {
    %c0_i32 = arith.constant 0 : i32
    %c0_i32_0 = arith.constant 0 : i32
    %c0_i32_1 = arith.constant 0 : i32
    return %c0_i32, %c0_i32_0 : i32, i32
  }
  func.func @transform_2(%arg0: i32) -> (i32, i32) {
    %c0_i32 = arith.constant 0 : i32
    %c0_i32_0 = arith.constant 0 : i32
    %c0_i32_1 = arith.constant 0 : i32
    return %c0_i32, %c0_i32_0 : i32, i32
  }
  func.func @transform_3(%arg0: i32) -> (i32, i32) {
    %c0_i32 = arith.constant 0 : i32
    %c0_i32_0 = arith.constant 0 : i32
    %c0_i32_1 = arith.constant 0 : i32
    return %c0_i32, %c0_i32_0 : i32, i32
  }
  func.func @transform_4(%arg0: i32) -> (i32, i32) {
    %c0_i32 = arith.constant 0 : i32
    %c0_i32_0 = arith.constant 0 : i32
    %c0_i32_1 = arith.constant 0 : i32
    return %c0_i32, %c0_i32_0 : i32, i32
  }
  func.func @transform_5(%arg0: i32) -> (i32, i32) {
    %c0_i32 = arith.constant 0 : i32
    %c0_i32_0 = arith.constant 0 : i32
    %c0_i32_1 = arith.constant 0 : i32
    return %c0_i32, %c0_i32_0 : i32, i32
  }
  func.func @transform_6(%arg0: i32) -> (i32, i32) {
    %c0_i32 = arith.constant 0 : i32
    %c0_i32_0 = arith.constant 0 : i32
    %c0_i32_1 = arith.constant 0 : i32
    return %c0_i32, %c0_i32_0 : i32, i32
  }
  func.func @transform_7(%arg0: i32) -> (i32, i32) {
    %c0_i32 = arith.constant 0 : i32
    %c0_i32_0 = arith.constant 0 : i32
    return %arg0, %c0_i32 : i32, i32
  }
}

</mosaic_0001>

<bundles_post_ra>
// kernel: positionwise_feed_forward.1
= control target key start
LH: loop header
LB: loop body
LE: loop exit
PB: predicated region body
PF: predicated region fallthrough
CT: control target
= control target key end

     0   :  { %12 = vsyncpa [#allocation3], 0  ;;  %s2215_s0 = inlined_call_operand.hbm [shape: f32[256,128], index: 0, kind: input, shape index: {}]   ;;  %s2216_s1 = inlined_call_operand.hbm [shape: f32[128,256], index: 1, kind: input, shape index: {}]   ;;  %s2217_s2 = inlined_call_operand.vmem [shape: f32[1,256], index: 2, kind: input, shape index: {}]   ;;  %s2218_s3 = inlined_call_operand.hbm [shape: f32[256,128], index: 3, kind: input, shape index: {}]   ;;  %s2219_s4 = inlined_call_operand.vmem [shape: f32[1,128], index: 4, kind: input, shape index: {}]   ;;  %s2220_s5 = inlined_call_operand.vmem [shape: f32[1,128], index: 5, kind: input, shape index: {}]   ;;  %s2221_s6 = inlined_call_operand.vmem [shape: f32[1,128], index: 6, kind: input, shape index: {}]   ;;  %s2222_s7 = inlined_call_operand.hbm [shape: f32[256,128], index: 7, kind: output, shape index: {}]  }
   0x1   :  { %14 = vsyncpa [#allocation3 + $0x1], 0 }
   0x2   :  { %15 = vsyncpa [#allocation6], 0 }
   0x3   :  { %16 = vsyncpa [#allocation4], 0 }
   0x4   :  { %18 = vsyncpa [#allocation4 + $0x1], 0  ;;  %s1608_s24 = smov 0   ;;  %s1610_s25 = smov 0  }
   0x5   :  { %s1612_s26 = smov 0   ;;  %s1614_s27 = smov 0  }
   0x6 LB: > { %s1629_s28 = sadd.s32 4294967295, %s1555_s27   ;;  %s1126_s29 = sadd.s32 4294967294, %s1555_s27   ;;  %s1555_s27 = sphi %s1614_s27, %s2244_s27   ;;  %s1551_s26 = sphi %s1612_s26, %s2243_s26   ;;  %s1547_s25 = sphi %s1610_s25, %s2242_s25   ;;  %s1543_s24 = sphi %s1608_s24, %s2241_s24  }
   0x7   : > { %p44_p0 = scmp.ne.s32.totalorder %s1547_s25, %s1543_s24  ;;  %p2223_p1 = scmp.eq.s32.totalorder %s1629_s28, 0 }
   0x8   : > { %p200_p3 = scmp.eq.s32.totalorder %s1126_s29, 1  ;;  %p1127_p5 = scmp.ge.s32.totalorder %s1555_s27, 1 }
   0x9   : > { %p1638_p4 = por %p2223_p1, %p44_p0  ;;  %p207_p7 = scmp.lt.s32.totalorder %s1555_s27, 3 }
   0xa   : > { %p1643_p6 = por %p200_p3, %p44_p0  ;;  %s1557_s10 = smov [#allocation5]  }
   0xb   : > { %s2227_s30 = scalar_select %p1638_p4, 1, 0 }
   0xc   : > { %s2228_s8 = scalar_select %p1643_p6, 1, 0 }
   0xd   : > { %p1648_p8 = pnand %p1127_p5, %p207_p7  ;;  %s219_s11 = sshll.u32 %s1557_s10, 4  ;;  %s1652_s11 = int_to_ptr.vmem [resolvable:$true] %s219_s11 }
   0xe   : > { %s1558_s13 = smov [#allocation7]   ;;  %s1399_s17 = scalar_lea.hbm %s2216_s1, 4096 }
   0xf   : > { %p1305_p9 = pneg %p1648_p8  ;;  %s235_s14 = sshll.u32 %s1558_s13, 4  ;;  %s1663_s14 = int_to_ptr.vmem [resolvable:$true] %s235_s14 }
  0x10   : > { %p1400_p12 = scmp.ne.s32.totalorder %s2216_s1, %s1399_s17  ;;  %p1406_p5 = scmp.lt.u32.totalorder %s1399_s17, %s2216_s1 }
  0x11   : > { %p1659_p11 = pnand %p1305_p9, %p2223_p1 }
  0x13   : > { %p1401_p13 = pneg %p1659_p11 }
  0x15   : > { %p1402_p0 = pnand %p1401_p13, %p1400_p12 }
  0x17   : > { %p1403_p3 = pneg %p1402_p0 }
  0x19   : > { %p1408_p7 = pnand %p1406_p5, %p1403_p3 }
  0x1b   : > { %1411 = shalt.err (!%p1408_p7)
}
  0x1c   : > { %s1412_s22 = scalar_lea.vmem %s1652_s11, 4096  ;;  %p1420_p2 = scmp.lt.s32.totalorder %s1652_s11, %s1652_s11 }
  0x1d   : > { %p1413_p9 = scmp.ne.s32.totalorder %s1652_s11, %s1412_s22  ;;  %p1421_p12 = scmp.lt.s32.totalorder %s1412_s22, %s1412_s22 }
  0x1f   : > { %p1415_p10 = pnand %p1413_p9, %p1401_p13  ;;  %p1422_p0 = por %p1421_p12, %p1420_p2 }
  0x21   : > { %p1416_p1 = pneg %p1415_p10 }
  0x23   : > { %p1423_p6 = pnand %p1422_p0, %p1416_p1 }
  0x25   : > { %1426 = shalt.err (!%p1423_p6)
}
  0x26   : > { %s1559_s23 = smov 256   ;;  %s1560_s29 = smov 16  }
  0x27   : > { %1308 = dma.hbm_to_vmem [thread:$0]  (!%p1659_p11), %s2216_s1, 4096, %s1652_s11, [#allocation6], %s1559_s23, %s1559_s23, %s1560_s29  }
  0x28   : > { %s1427_s17 = scalar_lea.hbm %s2218_s3, 4096 }
  0x29   : > { %p1428_p2 = scmp.ne.s32.totalorder %s2218_s3, %s1427_s17  ;;  %p1434_p10 = scmp.lt.u32.totalorder %s1427_s17, %s2218_s3 }
  0x2b   : > { %p1430_p1 = pnand %p1428_p2, %p1401_p13 }
  0x2d   : > { %p1431_p6 = pneg %p1430_p1 }
  0x2f   : > { %p1436_p3 = pnand %p1434_p10, %p1431_p6 }
  0x31   : > { %1439 = shalt.err (!%p1436_p3)
}
  0x32   : > { %s1440_s11 = scalar_lea.vmem %s1663_s14, 4096  ;;  %p1448_p12 = scmp.lt.s32.totalorder %s1663_s14, %s1663_s14 }
  0x33   : > { %p1441_p5 = scmp.ne.s32.totalorder %s1663_s14, %s1440_s11  ;;  %p1449_p0 = scmp.lt.s32.totalorder %s1440_s11, %s1440_s11 }
  0x35   : > { %p1443_p7 = pnand %p1441_p5, %p1401_p13  ;;  %p1450_p2 = por %p1449_p0, %p1448_p12 }
  0x37   : > { %p1444_p9 = pneg %p1443_p7 }
  0x39   : > { %p1451_p1 = pnand %p1450_p2, %p1444_p9 }
  0x3b   : > { %1454 = shalt.err (!%p1451_p1)
}
  0x3c   : > { %s2224_s22 = smov 128   ;;  %s1562_s23 = smov 8  }
  0x3d   : > { %1311 = dma.hbm_to_vmem [thread:$0]  (!%p1659_p11), %s2218_s3, 4096, %s1663_s14, [#allocation6], %s2224_s22, %s2224_s22, %s1562_s23  }
  0x3e   : > { %s1721_s13 = sadd.s32 1, %s1555_s27   ;;  %s31_s16 = sadd.s32 1, %s1551_s26 }
  0x3f   : > { %s28_s15 = ssub.s32 %s1555_s27, %s1721_s13  ;;  %p38_p6 = scmp.ne.s32.totalorder %s1551_s26, %s1547_s25 }
  0x40   : > { %p29_p13 = scmp.eq.s32.totalorder %s28_s15, 0  ;;  %p39_p10 = scmp.eq.s32.totalorder %s1555_s27, 0 }
  0x41   : > { %p2231_p5 = scmp.eq.s32.totalorder %s1629_s28, 1  ;;  %p1322_p9 = scmp.lt.s32.totalorder %s1555_s27, 2 }
  0x42   : > { %s1730_s17 = scalar_select %p29_p13, %s1551_s26, %s31_s16  }
  0x43   : > { %p40_p3 = por %p39_p10, %p38_p6  ;;  %p1734_p7 = por %p2231_p5, %p38_p6 }
  0x44   : > { %s258_s18 = sand.u32 1, %s1551_s26   ;;  %s1147_s14 = sshll.u32 %s1555_s27, 11 }
  0x45   : > { %s2232_s12 = scalar_select %p1734_p7, 1, 0 }
  0x46   : > { %s1131_s19 = sshll.u32 %s258_s18, 7  ;;  %s1744_s11 = scalar_lea.hbm %s2215_s0, %s1147_s14 }
  0x47   : > { %s262_s29 = scalar_lea.vmem [#allocation2], %s1131_s19  ;;  %p1748_p11 = pnand %p1322_p9, %p40_p3 }
  0x48   : > { %s269_s10 = sshll.u32 %s262_s29, 4  ;;  %s1752_s16 = scalar_lea.sflag [#allocation3], %s258_s18  ;;  %s1746_s10 = int_to_ptr.vmem [resolvable:$true] %s269_s10 }
  0x49   : > { %s1455_s22 = scalar_lea.hbm %s1744_s11, 2048  ;;  %p1457_p0 = pneg %p1748_p11 }
  0x4a   : > { %p1456_p12 = scmp.ne.s32.totalorder %s1744_s11, %s1455_s22  ;;  %s1460_s20 = scalar_lea.hbm %s2215_s0, 4096 }
  0x4b   : > { %p1461_p13 = scmp.lt.u32.totalorder %s1744_s11, %s2215_s0  ;;  %p1462_p6 = scmp.lt.u32.totalorder %s1460_s20, %s1455_s22 }
  0x4c   : > { %p1458_p2 = pnand %p1457_p0, %p1456_p12  ;;  %p1464_p3 = scmp.lt.u32.totalorder %s1455_s22, %s1744_s11 }
  0x4d   : > { %p1463_p10 = por %p1462_p6, %p1461_p13 }
  0x4e   : > { %p1459_p1 = pneg %p1458_p2 }
  0x4f   : > { %p1465_p5 = por %p1464_p3, %p1463_p10 }
  0x51   : > { %p1466_p9 = pnand %p1465_p5, %p1459_p1 }
  0x53   : > { %1469 = shalt.err (!%p1466_p9)
}
  0x54   : > { %s1470_s18 = scalar_lea.vmem %s1746_s10, 2048  ;;  %s1563_s19 = smov [#allocation2]  }
  0x55   : > { %p1471_p12 = scmp.ne.s32.totalorder %s1746_s10, %s1470_s18  ;;  %s1475_s14 = sshll.u32 %s1563_s19, 4  ;;  %s1476_s14 = int_to_ptr.vmem [resolvable:$false] %s1475_s14 }
  0x56   : > { %s1477_s21 = scalar_lea.vmem %s1476_s14, 4096  ;;  %p1478_p4 = scmp.lt.s32.totalorder %s1746_s10, %s1476_s14 }
  0x57   : > { %p1473_p2 = pnand %p1471_p12, %p1457_p0  ;;  %p1479_p13 = scmp.lt.s32.totalorder %s1477_s21, %s1470_s18 }
  0x59   : > { %p1474_p7 = pneg %p1473_p2  ;;  %p1480_p6 = por %p1479_p13, %p1478_p4 }
  0x5b   : > { %p1481_p10 = pnand %p1480_p6, %p1474_p7 }
  0x5d   : > { %1484 = shalt.err (!%p1481_p10)
}
  0x5e   : > { %s2234_s22 = smov 128   ;;  %281 = sbr.rel (%p1648_p8) target bundleno = 963 (0x3c3), region = 48 }
  0x5f   : > { %1315 = dma.hbm_to_vmem [thread:$0]  (!%p1748_p11), %s1744_s11, 2048, %s1746_s10, %s1752_s16, %s2234_s22, %s2234_s22, %s1562_s23  }
  0x60   : > { %s1786_s20 = sand.u32 (!%p1648_p8), 1, %s1547_s25   ;;  %p2235_p4 = scmp.ne.s32.totalorder (!%p1648_p8), %s2227_s30, 0 }
  0x61   : > { %s1135_s29 = sshll.u32 (!%p1648_p8), %s1786_s20, 7  ;;  %s284_s18 = scalar_lea.sflag (!%p1648_p8), [#allocation3], %s1786_s20 }
  0x62   : > { %s1792_s15 = scalar_lea.vmem (!%p1648_p8), [#allocation2], %s1135_s29 }
  0x65   : > { %1530 = dma.done.wait (%p2235_p4), %s284_s18, 2048  }
  0x66   : > { %1532 = vsyncadd (%p2235_p4), %s284_s18, 4294965248  ;;  %p2236_p7 = scmp.eq.s32.totalorder %s1629_s28, 0 }
  0x68   : > { %1534 = dma.done.wait (%p2236_p7), [#allocation6], 8192   ;;  %p2237_p8 = pmov %p2236_p7 }
  0x69   : > { %v1564_v0 = vmov 0.0   ;;  %v345_v1 = vld [vmem:[#allocation5 + $0x8] sm:$0xff]  ;;  %v347_v2 = vld [vmem:[#allocation5 + $0x18] sm:$0xff]  ;;  %v344_v3 = vld [vmem:[#allocation5] sm:$0xff]  ;;  %s2102_s21 = scalar_lea.vmem [#allocation8], %s1135_s29  ;;  %s1148_s22 = sshll.u32 %s1629_s28, 11 }
  0x6a   : > { %1536 = vsyncadd (%p2237_p8), [#allocation6], 4294959104  ;;  %452 = vmatprep.mubr.f32.mxu0 %v1564_v0  ;;  %v1229_v4 = vpack.c.bf16 %v347_v2, %v345_v1  ;;  %v346_v5 = vld [vmem:[#allocation5 + $0x10] sm:$0xff]  ;;  %v349_v6 = vld [vmem:[#allocation5 + $0x28] sm:$0xff]  ;;  %s1034_s29 = sshll.u32 %s2102_s21, 4  ;;  %s2167_s30 = scalar_lea.hbm %s2222_s7, %s1148_s22  ;;  %s2169_s29 = int_to_ptr.vmem [resolvable:$true] %s1034_s29 }
  0x6b   : > { %v351_v7 = vld [vmem:[#allocation5 + $0x38] sm:$0xff]  ;;  %v1231_v8 = vpack.c.bf16 %v346_v5, %v344_v3  ;;  %v348_v10 = vld [vmem:[#allocation5 + $0x20] sm:$0xff]  ;;  %v350_v11 = vld [vmem:[#allocation5 + $0x30] sm:$0xff]  ;;  %s1021_s9 = scalar_lea.sflag [#allocation4], %s1786_s20  ;;  %s1485_s23 = scalar_lea.vmem %s2169_s29, 2048 }
  0x6c   : > { %v1233_v9 = vpack.c.bf16 %v351_v7, %v349_v6  ;;  %v353_v12 = vld [vmem:[#allocation5 + $0x48] sm:$0xff]  ;;  %1230 = vmatprep.subr.bf16.mxu0 %v1229_v4  ;;  %v355_v13 = vld [vmem:[#allocation5 + $0x58] sm:$0xff]  ;;  %v1235_v14 = vpack.c.bf16 %v350_v11, %v348_v10  ;;  %v352_v16 = vld [vmem:[#allocation5 + $0x40] sm:$0xff]  ;;  %p1486_p11 = scmp.ne.s32.totalorder %s2169_s29, %s1485_s23  ;;  %p2238_p0 = scmp.ne.s32.totalorder %s2232_s12, 0 }
  0x6d   : > { %1232 = vmatpush1.bf16.msra.mxu0 %v1231_v8  ;;  %v1237_v15 = vpack.c.bf16 %v355_v13, %v353_v12  ;;  %v354_v17 = vld [vmem:[#allocation5 + $0x50] sm:$0xff]  ;;  %v357_v18 = vld [vmem:[#allocation5 + $0x68] sm:$0xff]  ;;  %v359_v19 = vld [vmem:[#allocation5 + $0x78] sm:$0xff]  ;;  %s1565_s28 = smov [#allocation8]  }
  0x6e   : > { %1234 = vmatprep.subr.bf16.mxu0 %v1233_v9  ;;  %v1239_v20 = vpack.c.bf16 %v354_v17, %v352_v16  ;;  %v1241_v21 = vpack.c.bf16 %v359_v19, %v357_v18  ;;  %v356_v22 = vld [vmem:[#allocation5 + $0x60] sm:$0xff]  ;;  %v358_v23 = vld [vmem:[#allocation5 + $0x70] sm:$0xff]  ;;  %v361_v24 = vld [vmem:[#allocation5 + $0x88] sm:$0xff]  ;;  %p1487_p1 = pnand %p1486_p11, %p2238_p0  ;;  %s1489_s11 = sshll.u32 %s1565_s28, 4  ;;  %s1490_s11 = int_to_ptr.vmem [resolvable:$false] %s1489_s11 }
  0x6f   : > { %v363_v25 = vld [vmem:[#allocation5 + $0x98] sm:$0xff]  ;;  %v1243_v26 = vpack.c.bf16 %v358_v23, %v356_v22  ;;  %v360_v28 = vld [vmem:[#allocation5 + $0x80] sm:$0xff]  ;;  %v362_v29 = vld [vmem:[#allocation5 + $0x90] sm:$0xff]  ;;  %s1491_s10 = scalar_lea.vmem %s1490_s11, 4096  ;;  %p1492_p5 = scmp.lt.s32.totalorder %s2169_s29, %s1490_s11 }
  0x70   : > { %v1245_v27 = vpack.c.bf16 %v363_v25, %v361_v24  ;;  %v365_v30 = vld [vmem:[#allocation5 + $0xa8] sm:$0xff]  ;;  %v367_v31 = vld [vmem:[#allocation5 + $0xb8] sm:$0xff]  ;;  %v364_v32 = vld [vmem:[#allocation5 + $0xa0] sm:$0xff]  ;;  %v1247_v34 = vpack.c.bf16 %v362_v29, %v360_v28  ;;  %p1488_p3 = pneg %p1487_p1  ;;  %p1493_p9 = scmp.lt.s32.totalorder %s1491_s10, %s1485_s23 }
  0x71   : > { %1236 = vmatpush1.bf16.msra.mxu0 %v1235_v14  ;;  %v366_v33 = vld [vmem:[#allocation5 + $0xb0] sm:$0xff]  ;;  %v369_v35 = vld [vmem:[#allocation5 + $0xc8] sm:$0xff]  ;;  %v371_v36 = vld [vmem:[#allocation5 + $0xd8] sm:$0xff]  ;;  %v1249_v40 = vpack.c.bf16 %v367_v31, %v365_v30 }
  0x72   : > { %1238 = vmatprep.subr.bf16.mxu0 %v1237_v15  ;;  %v597_v37 = vld [vmem:[#allocation7 + $0x80] sm:$0xff]  ;;  %v598_v38 = vld [vmem:[#allocation7 + $0x88] sm:$0xff]  ;;  %v599_v43 = vld [vmem:[#allocation7 + $0x90] sm:$0xff]  ;;  %v1251_v51 = vpack.c.bf16 %v366_v33, %v364_v32  ;;  %v1253_v55 = vpack.c.bf16 %v371_v36, %v369_v35  ;;  %p1494_p12 = por %p1493_p9, %p1492_p5 }
  0x73   : > { %v581_v39 = vld [vmem:[#allocation7] sm:$0xff]  ;;  %v1261_v41 = vpack.c.bf16 %v598_v38, %v597_v37  ;;  %v582_v42 = vld [vmem:[#allocation7 + $0x8] sm:$0xff]  ;;  %v600_v44 = vld [vmem:[#allocation7 + $0x98] sm:$0xff] }
  0x74   : > { %v1263_v45 = vpack.c.bf16 %v582_v42, %v581_v39  ;;  %v1265_v46 = vpack.c.bf16 %v600_v44, %v599_v43  ;;  %v583_v47 = vld [vmem:[#allocation7 + $0x10] sm:$0xff]  ;;  %v584_v48 = vld [vmem:[#allocation7 + $0x18] sm:$0xff]  ;;  %v601_v49 = vld [vmem:[#allocation7 + $0xa0] sm:$0xff]  ;;  %p1495_p2 = pnand %p1494_p12, %p1488_p3 }
  0x75   : > { %1240 = vmatpush1.bf16.msra.mxu0 %v1239_v20  ;;  %1262 = vmatprep.subr.bf16.mxu1 %v1261_v41  ;;  %v602_v50 = vld [vmem:[#allocation7 + $0xa8] sm:$0xff]  ;;  %v368_v52 = vld [vmem:[#allocation5 + $0xc0] sm:$0xff]  ;;  %v370_v53 = vld [vmem:[#allocation5 + $0xd0] sm:$0xff]  ;;  %v1267_v54 = vpack.c.bf16 %v584_v48, %v583_v47 }
  0x76   : > { %1242 = vmatprep.subr.bf16.mxu0 %v1241_v21  ;;  %1264 = vmatpush3.bf16.msra.mxu1 %v1263_v45  ;;  %v373_v56 = vld [vmem:[#allocation5 + $0xe8] sm:$0xff]  ;;  %v1269_v57 = vpack.c.bf16 %v602_v50, %v601_v49  ;;  %v585_v58 = vld [vmem:[#allocation7 + $0x20] sm:$0xff]  ;;  %v375_v60 = vld [vmem:[#allocation5 + $0xf8] sm:$0xff]  ;;  %v1255_v63 = vpack.c.bf16 %v370_v53, %v368_v52  ;;  %v378_v50 = vlaneseq }
  0x77   : > { %1266 = vmatprep.subr.bf16.mxu1 %v1265_v46  ;;  %v586_v59 = vld [vmem:[#allocation7 + $0x28] sm:$0xff]  ;;  %v603_v61 = vld [vmem:[#allocation7 + $0xb0] sm:$0xff]  ;;  %v604_v62 = vld [vmem:[#allocation7 + $0xb8] sm:$0xff]  ;;  %v1257_v3 = vpack.c.bf16 %v375_v60, %v373_v56 }
  0x78   : > { %v372_v1 = vld [vmem:[#allocation5 + $0xe0] sm:$0xff]  ;;  %v1271_v2 = vpack.c.bf16 %v586_v59, %v585_v58  ;;  %v374_v4 = vld [vmem:[#allocation5 + $0xf0] sm:$0xff]  ;;  %v1273_v5 = vpack.c.bf16 %v604_v62, %v603_v61  ;;  %v588_v7 = vld [vmem:[#allocation7 + $0x38] sm:$0xff] }
  0x79   : > { %1244 = vmatpush1.bf16.msra.mxu0 %v1243_v26  ;;  %v587_v6 = vld [vmem:[#allocation7 + $0x30] sm:$0xff]  ;;  %v605_v8 = vld [vmem:[#allocation7 + $0xc0] sm:$0xff]  ;;  %v606_v9 = vld [vmem:[#allocation7 + $0xc8] sm:$0xff]  ;;  %v1259_v10 = vpack.c.bf16 %v374_v4, %v372_v1 }
  0x7a   : > { %1246 = vmatprep.subr.bf16.mxu0 %v1245_v27  ;;  %1268 = vmatpush3.bf16.msra.mxu1 %v1267_v54  ;;  %v1275_v11 = vpack.c.bf16 %v588_v7, %v587_v6  ;;  %v1277_v12 = vpack.c.bf16 %v606_v9, %v605_v8  ;;  %v589_v13 = vld [vmem:[#allocation7 + $0x40] sm:$0xff]  ;;  %v590_v14 = vld [vmem:[#allocation7 + $0x48] sm:$0xff]  ;;  %v607_v15 = vld [vmem:[#allocation7 + $0xd0] sm:$0xff] }
  0x7b   : > { %1270 = vmatprep.subr.bf16.mxu1 %v1269_v57  ;;  %v608_v16 = vld [vmem:[#allocation7 + $0xd8] sm:$0xff]  ;;  %v1804_v17 = vld [vmem:[%s1792_s15] sm:$0xff]  ;;  %v1279_v18 = vpack.c.bf16 %v590_v14, %v589_v13  ;;  %v591_v20 = vld [vmem:[#allocation7 + $0x50] sm:$0xff] }
  0x7c   : > { %v1281_v19 = vpack.c.bf16 %v608_v16, %v607_v15  ;;  %v592_v21 = vld [vmem:[#allocation7 + $0x58] sm:$0xff]  ;;  %v609_v22 = vld [vmem:[#allocation7 + $0xe0] sm:$0xff]  ;;  %v610_v23 = vld [vmem:[#allocation7 + $0xe8] sm:$0xff] }
  0x7d   : > { %1248 = vmatpush1.bf16.msra.mxu0 %v1247_v34  ;;  %v1809_v24 = vld [vmem:[%s1792_s15 + $0x8] sm:$0xff]  ;;  %v1283_v25 = vpack.c.bf16 %v592_v21, %v591_v20  ;;  %v1285_v26 = vpack.c.bf16 %v610_v23, %v609_v22  ;;  %v1814_v27 = vld [vmem:[%s1792_s15 + $0x10] sm:$0xff]  ;;  %v1819_v28 = vld [vmem:[%s1792_s15 + $0x18] sm:$0xff] }
  0x7e   : > { %1250 = vmatprep.subr.bf16.mxu0 %v1249_v40  ;;  %1272 = vmatpush3.bf16.msra.mxu1 %v1271_v2  ;;  %v1824_v29 = vld [vmem:[%s1792_s15 + $0x20] sm:$0xff]  ;;  %v1829_v30 = vld [vmem:[%s1792_s15 + $0x28] sm:$0xff]  ;;  %v1834_v31 = vld [vmem:[%s1792_s15 + $0x30] sm:$0xff] }
  0x7f   : > { %1274 = vmatprep.subr.bf16.mxu1 %v1273_v5  ;;  %v1839_v32 = vld [vmem:[%s1792_s15 + $0x38] sm:$0xff]  ;;  %v1844_v33 = vld [vmem:[%s1792_s15 + $0x40] sm:$0xff]  ;;  %v1849_v34 = vld [vmem:[%s1792_s15 + $0x48] sm:$0xff] }
  0x80   : > { %v1854_v35 = vld [vmem:[%s1792_s15 + $0x50] sm:$0xff]  ;;  %v1859_v36 = vld [vmem:[%s1792_s15 + $0x58] sm:$0xff]  ;;  %v1864_v37 = vld [vmem:[%s1792_s15 + $0x60] sm:$0xff] }
  0x81   : > { %1252 = vmatpush1.bf16.msra.mxu0 %v1251_v51  ;;  %v1869_v38 = vld [vmem:[%s1792_s15 + $0x68] sm:$0xff]  ;;  %v1874_v39 = vld [vmem:[%s1792_s15 + $0x70] sm:$0xff]  ;;  %v1879_v40 = vld [vmem:[%s1792_s15 + $0x78] sm:$0xff]  ;;  %v379_v51 = vshrl.u32 %v378_v50, 7 }
  0x82   : > { %1254 = vmatprep.subr.bf16.mxu0 %v1253_v55  ;;  %1276 = vmatpush3.bf16.msra.mxu1 %v1275_v11  ;;  %v593_v41 = vld [vmem:[#allocation7 + $0x60] sm:$0xff]  ;;  %v594_v42 = vld [vmem:[#allocation7 + $0x68] sm:$0xff]  ;;  %v611_v44 = vld [vmem:[#allocation7 + $0xf0] sm:$0xff] }
  0x83   : > { %1278 = vmatprep.subr.bf16.mxu1 %v1277_v12  ;;  %v1287_v43 = vpack.c.bf16 %v594_v42, %v593_v41  ;;  %v612_v45 = vld [vmem:[#allocation7 + $0xf8] sm:$0xff]  ;;  %v595_v47 = vld [vmem:[#allocation7 + $0x70] sm:$0xff]  ;;  %v380_v52 = vsub.s32 0, %v379_v51  ;;  %v384_v53 = vsub.s32 1, %v379_v51 }
  0x84   : > { %v1289_v46 = vpack.c.bf16 %v612_v45, %v611_v44  ;;  %v596_v48 = vld [vmem:[#allocation7 + $0x78] sm:$0xff] }
  0x85   : > { %1256 = vmatpush1.bf16.msra.mxu0 %v1255_v63  ;;  %v1291_v49 = vpack.c.bf16 %v596_v48, %v595_v47 }
  0x86   : > { %1258 = vmatprep.subr.bf16.mxu0 %v1257_v3  ;;  %1280 = vmatpush3.bf16.msra.mxu1 %v1279_v18 }
  0x87   : > { %1282 = vmatprep.subr.bf16.mxu1 %v1281_v19 }
  0x89   : > { %1260 = vmatpush1.bf16.msra.mxu0 %v1259_v10 }
  0x8a   : > { %1284 = vmatpush3.bf16.msra.mxu1 %v1283_v25 }
  0x8b   : > { %1286 = vmatprep.subr.bf16.mxu1 %v1285_v26 }
  0x8c   : > { %453 = vmatmul.mubr.f32.vlgmr.msra.gmra.mrb[0].mxu0 %v1804_v17 }
  0x8d   : > { %458 = vmatprep.mubr.f32.mxu0 %v1564_v0 }
  0x8e   : > { %1288 = vmatpush3.bf16.msra.mxu1 %v1287_v43 }
  0x8f   : > { %1290 = vmatprep.subr.bf16.mxu1 %v1289_v46 }
  0x90   : > { %459 = vmatmul.mubr.f32.gmra.mrb[2].mxu0 %v1809_v24 }
  0x91   : > { %464 = vmatprep.mubr.f32.mxu0 %v1564_v0 }
  0x92   : > { %1292 = vmatpush3.bf16.msra.mxu1 %v1291_v49 }
  0x94   : > { %465 = vmatmul.mubr.f32.gmra.mrb[4].mxu0 %v1814_v27 }
  0x95   : > { %470 = vmatprep.mubr.f32.mxu0 %v1564_v0 }
  0x98   : > { %471 = vmatmul.mubr.f32.gmra.mrb[6].mxu0 %v1819_v28 }
  0x99   : > { %476 = vmatprep.mubr.f32.mxu0 %v1564_v0 }
  0x9c   : > { %477 = vmatmul.mubr.f32.gmra.mrb[8].mxu0 %v1824_v29 }
  0x9d   : > { %482 = vmatprep.mubr.f32.mxu0 %v1564_v0 }
  0xa0   : > { %483 = vmatmul.mubr.f32.gmra.mrb[10].mxu0 %v1829_v30 }
  0xa1   : > { %488 = vmatprep.mubr.f32.mxu0 %v1564_v0 }
  0xa4   : > { %489 = vmatmul.mubr.f32.gmra.mrb[12].mxu0 %v1834_v31 }
  0xa5   : > { %494 = vmatprep.mubr.f32.mxu0 %v1564_v0 }
  0xa8   : > { %495 = vmatmul.mubr.f32.gmra.mrb[14].mxu0 %v1839_v32 }
  0xa9   : > { %500 = vmatprep.mubr.f32.mxu0 %v1564_v0 }
  0xac   : > { %501 = vmatmul.mubr.f32.gmra.mrb[16].mxu0 %v1844_v33 }
  0xad   : > { %506 = vmatprep.mubr.f32.mxu0 %v1564_v0 }
  0xb0   : > { %507 = vmatmul.mubr.f32.gmra.mrb[18].mxu0 %v1849_v34 }
  0xb1   : > { %512 = vmatprep.mubr.f32.mxu0 %v1564_v0 }
  0xb4   : > { %513 = vmatmul.mubr.f32.gmra.mrb[20].mxu0 %v1854_v35 }
  0xb5   : > { %518 = vmatprep.mubr.f32.mxu0 %v1564_v0 }
  0xb8   : > { %519 = vmatmul.mubr.f32.gmra.mrb[22].mxu0 %v1859_v36 }
  0xb9   : > { %524 = vmatprep.mubr.f32.mxu0 %v1564_v0 }
  0xbc   : > { %525 = vmatmul.mubr.f32.gmra.mrb[24].mxu0 %v1864_v37 }
  0xbd   : > { %530 = vmatprep.mubr.f32.mxu0 %v1564_v0 }
  0xc0   : > { %531 = vmatmul.mubr.f32.gmra.mrb[26].mxu0 %v1869_v38 }
  0xc1   : > { %536 = vmatprep.mubr.f32.mxu0 %v1564_v0 }
  0xc4   : > { %537 = vmatmul.mubr.f32.gmra.mrb[28].mxu0 %v1874_v39 }
  0xc5   : > { %542 = vmatprep.mubr.f32.mxu0 %v1564_v0  ;;  %v376_v0 = vld [vmem:[%s2217_s2] sm:$0x3] }
  0xc6   : > { %v1885_v54 = vrot.slane %v376_v0, %v380_v52  ;;  %v1887_v55 = vrot.slane %v376_v0, %v384_v53 }
  0xc8   : > { %543 = vmatmul.mubr.f32.gmra.mrb[30].mxu0 %v1879_v40 }
 0x15f   : > { %v454_v56 = vpop.f32.mrb[0].mxu0 }
 0x160   : > { %v455_v57 = vadd.f32 %v454_v56, %v1885_v54  ;;  %v456_v58 = vpop.f32.mrb[1].mxu0 }
 0x161   : > { %v457_v59 = vadd.f32 %v456_v58, %v1887_v55 }
 0x162   : > { %v549_v62 = vmax.f32 %v455_v57, 0.0 }
 0x163   : > { %v460_v60 = vpop.f32.mrb[2].mxu0  ;;  %v550_v61 = vmax.f32 %v457_v59, 0.0 }
 0x164   : > { %v461_v63 = vadd.f32 %v460_v60, %v1885_v54  ;;  %v462_v1 = vpop.f32.mrb[3].mxu0 }
 0x165   : > { %v463_v2 = vadd.f32 %v462_v1, %v1887_v55  ;;  %684 = vmatprep.mubr.f32.mxu1 %v550_v61 }
 0x166   : > { %685 = vmatmul.mubr.f32.vlgmr.msra.gmra.mrb[0].mxu1 %v549_v62  ;;  %v551_v5 = vmax.f32 %v461_v63, 0.0 }
 0x167   : > { %v552_v3 = vmax.f32 %v463_v2, 0.0  ;;  %v466_v4 = vpop.f32.mrb[4].mxu0 }
 0x168   : > { %v467_v6 = vadd.f32 %v466_v4, %v1885_v54  ;;  %v468_v7 = vpop.f32.mrb[5].mxu0 }
 0x169   : > { %v469_v8 = vadd.f32 %v468_v7, %v1887_v55  ;;  %689 = vmatprep.mubr.f32.mxu1 %v552_v3 }
 0x16a   : > { %690 = vmatmul.mubr.f32.gmra.mrb[2].mxu1 %v551_v5  ;;  %v553_v11 = vmax.f32 %v467_v6, 0.0 }
 0x16b   : > { %v554_v9 = vmax.f32 %v469_v8, 0.0  ;;  %v472_v10 = vpop.f32.mrb[6].mxu0 }
 0x16c   : > { %v473_v12 = vadd.f32 %v472_v10, %v1885_v54  ;;  %v474_v13 = vpop.f32.mrb[7].mxu0 }
 0x16d   : > { %v475_v14 = vadd.f32 %v474_v13, %v1887_v55  ;;  %694 = vmatprep.mubr.f32.mxu1 %v554_v9 }
 0x16e   : > { %695 = vmatmul.mubr.f32.gmra.mrb[4].mxu1 %v553_v11  ;;  %v555_v18 = vmax.f32 %v473_v12, 0.0 }
 0x16f   : > { %v556_v15 = vmax.f32 %v475_v14, 0.0  ;;  %v478_v16 = vpop.f32.mrb[8].mxu0 }
 0x170   : > { %v479_v19 = vadd.f32 %v478_v16, %v1885_v54  ;;  %v480_v20 = vpop.f32.mrb[9].mxu0 }
 0x171   : > { %v481_v21 = vadd.f32 %v480_v20, %v1887_v55  ;;  %699 = vmatprep.mubr.f32.mxu1 %v556_v15 }
 0x172   : > { %700 = vmatmul.mubr.f32.gmra.mrb[6].mxu1 %v555_v18  ;;  %v557_v25 = vmax.f32 %v479_v19, 0.0 }
 0x173   : > { %v558_v22 = vmax.f32 %v481_v21, 0.0  ;;  %v484_v23 = vpop.f32.mrb[10].mxu0 }
 0x174   : > { %v485_v26 = vadd.f32 %v484_v23, %v1885_v54  ;;  %v486_v41 = vpop.f32.mrb[11].mxu0 }
 0x175   : > { %v487_v42 = vadd.f32 %v486_v41, %v1887_v55  ;;  %704 = vmatprep.mubr.f32.mxu1 %v558_v22 }
 0x176   : > { %705 = vmatmul.mubr.f32.gmra.mrb[8].mxu1 %v557_v25  ;;  %v559_v45 = vmax.f32 %v485_v26, 0.0 }
 0x177   : > { %v560_v43 = vmax.f32 %v487_v42, 0.0  ;;  %v490_v44 = vpop.f32.mrb[12].mxu0 }
 0x178   : > { %v491_v46 = vadd.f32 %v490_v44, %v1885_v54  ;;  %v492_v47 = vpop.f32.mrb[13].mxu0 }
 0x179   : > { %v493_v48 = vadd.f32 %v492_v47, %v1887_v55  ;;  %709 = vmatprep.mubr.f32.mxu1 %v560_v43 }
 0x17a   : > { %710 = vmatmul.mubr.f32.gmra.mrb[10].mxu1 %v559_v45  ;;  %v561_v51 = vmax.f32 %v491_v46, 0.0 }
 0x17b   : > { %v562_v49 = vmax.f32 %v493_v48, 0.0  ;;  %v496_v50 = vpop.f32.mrb[14].mxu0 }
 0x17c   : > { %v497_v52 = vadd.f32 %v496_v50, %v1885_v54  ;;  %v498_v0 = vpop.f32.mrb[15].mxu0 }
 0x17d   : > { %v499_v53 = vadd.f32 %v498_v0, %v1887_v55  ;;  %714 = vmatprep.mubr.f32.mxu1 %v562_v49 }
 0x17e   : > { %715 = vmatmul.mubr.f32.gmra.mrb[12].mxu1 %v561_v51  ;;  %v563_v58 = vmax.f32 %v497_v52, 0.0 }
 0x17f   : > { %v564_v56 = vmax.f32 %v499_v53, 0.0  ;;  %v502_v57 = vpop.f32.mrb[16].mxu0 }
 0x180   : > { %v503_v59 = vadd.f32 %v502_v57, %v1885_v54  ;;  %v504_v60 = vpop.f32.mrb[17].mxu0 }
 0x181   : > { %v505_v61 = vadd.f32 %v504_v60, %v1887_v55  ;;  %719 = vmatprep.mubr.f32.mxu1 %v564_v56 }
 0x182   : > { %720 = vmatmul.mubr.f32.gmra.mrb[14].mxu1 %v563_v58  ;;  %v565_v1 = vmax.f32 %v503_v59, 0.0 }
 0x183   : > { %v566_v62 = vmax.f32 %v505_v61, 0.0  ;;  %v508_v63 = vpop.f32.mrb[18].mxu0  ;;  %v1924_v61 = vld [vmem:[%s2219_s4] ss:$0 sm:$0xff] }
 0x184   : > { %v509_v2 = vadd.f32 %v508_v63, %v1885_v54  ;;  %v510_v3 = vpop.f32.mrb[19].mxu0 }
 0x185   : > { %v511_v4 = vadd.f32 %v510_v3, %v1887_v55  ;;  %724 = vmatprep.mubr.f32.mxu1 %v566_v62 }
 0x186   : > { %725 = vmatmul.mubr.f32.gmra.mrb[16].mxu1 %v565_v1  ;;  %v567_v7 = vmax.f32 %v509_v2, 0.0 }
 0x187   : > { %v568_v5 = vmax.f32 %v511_v4, 0.0  ;;  %v514_v6 = vpop.f32.mrb[20].mxu0 }
 0x188   : > { %v515_v8 = vadd.f32 %v514_v6, %v1885_v54  ;;  %v516_v9 = vpop.f32.mrb[21].mxu0 }
 0x189   : > { %v517_v10 = vadd.f32 %v516_v9, %v1887_v55  ;;  %729 = vmatprep.mubr.f32.mxu1 %v568_v5 }
 0x18a   : > { %730 = vmatmul.mubr.f32.gmra.mrb[18].mxu1 %v567_v7  ;;  %v569_v13 = vmax.f32 %v515_v8, 0.0 }
 0x18b   : > { %v570_v11 = vmax.f32 %v517_v10, 0.0  ;;  %v520_v12 = vpop.f32.mrb[22].mxu0 }
 0x18c   : > { %v521_v14 = vadd.f32 %v520_v12, %v1885_v54  ;;  %v522_v15 = vpop.f32.mrb[23].mxu0 }
 0x18d   : > { %v523_v16 = vadd.f32 %v522_v15, %v1887_v55  ;;  %734 = vmatprep.mubr.f32.mxu1 %v570_v11 }
 0x18e   : > { %735 = vmatmul.mubr.f32.gmra.mrb[20].mxu1 %v569_v13  ;;  %v571_v20 = vmax.f32 %v521_v14, 0.0 }
 0x18f   : > { %v572_v18 = vmax.f32 %v523_v16, 0.0  ;;  %v526_v19 = vpop.f32.mrb[24].mxu0 }
 0x190   : > { %v527_v21 = vadd.f32 %v526_v19, %v1885_v54  ;;  %v528_v22 = vpop.f32.mrb[25].mxu0 }
 0x191   : > { %v529_v23 = vadd.f32 %v528_v22, %v1887_v55  ;;  %739 = vmatprep.mubr.f32.mxu1 %v572_v18 }
 0x192   : > { %740 = vmatmul.mubr.f32.gmra.mrb[22].mxu1 %v571_v20  ;;  %v573_v41 = vmax.f32 %v527_v21, 0.0 }
 0x193   : > { %v574_v25 = vmax.f32 %v529_v23, 0.0  ;;  %v532_v26 = vpop.f32.mrb[26].mxu0 }
 0x194   : > { %v533_v42 = vadd.f32 %v532_v26, %v1885_v54  ;;  %v534_v43 = vpop.f32.mrb[27].mxu0 }
 0x195   : > { %v535_v44 = vadd.f32 %v534_v43, %v1887_v55  ;;  %744 = vmatprep.mubr.f32.mxu1 %v574_v25 }
 0x196   : > { %745 = vmatmul.mubr.f32.gmra.mrb[24].mxu1 %v573_v41  ;;  %v575_v47 = vmax.f32 %v533_v42, 0.0 }
 0x197   : > { %v576_v45 = vmax.f32 %v535_v44, 0.0  ;;  %v538_v46 = vpop.f32.mrb[28].mxu0 }
 0x198   : > { %v539_v48 = vadd.f32 %v538_v46, %v1885_v54  ;;  %v540_v49 = vpop.f32.mrb[29].mxu0 }
 0x199   : > { %v541_v50 = vadd.f32 %v540_v49, %v1887_v55  ;;  %749 = vmatprep.mubr.f32.mxu1 %v576_v45 }
 0x19a   : > { %750 = vmatmul.mubr.f32.gmra.mrb[26].mxu1 %v575_v47  ;;  %v577_v0 = vmax.f32 %v539_v48, 0.0 }
 0x19b   : > { %v578_v51 = vmax.f32 %v541_v50, 0.0  ;;  %v544_v52 = vpop.f32.mrb[30].mxu0 }
 0x19c   : > { %v545_v53 = vadd.f32 %v544_v52, %v1885_v54  ;;  %v546_v56 = vpop.f32.mrb[31].mxu0 }
 0x19d   : > { %v547_v57 = vadd.f32 %v546_v56, %v1887_v55  ;;  %754 = vmatprep.mubr.f32.mxu1 %v578_v51 }
 0x19e   : > { %755 = vmatmul.mubr.f32.gmra.mrb[28].mxu1 %v577_v0  ;;  %v579_v59 = vmax.f32 %v545_v53, 0.0 }
 0x19f   : > { %v580_v58 = vmax.f32 %v547_v57, 0.0 }
 0x1a1   : > { %759 = vmatprep.mubr.f32.mxu1 %v580_v58 }
 0x1a2   : > { %760 = vmatmul.mubr.f32.gmra.mrb[30].mxu1 %v579_v59 }
 0x239   : > { %v1181_v60 = vpop.f32.mrb[0].mxu1 }
 0x23a   : > { %v1182_v62 = vpop.f32.mrb[1].mxu1 }
 0x23b   : > { %v1183_v63 = vadd.f32 %v1182_v62, %v1181_v60 }
 0x23d   : > { %v687_v1 = vadd.f32 %v1183_v63, %v1924_v61  ;;  %v1184_v54 = vpop.f32.mrb[2].mxu1 }
 0x23e   : > { %v1185_v2 = vpop.f32.mrb[3].mxu1 }
 0x23f   : > { %v1186_v3 = vadd.f32 %v1185_v2, %v1184_v54  ;;  %v1928_v55 = vadd.f32 %v687_v1, %v1804_v17 }
 0x241   : > { %v692_v4 = vadd.f32 %v1186_v3, %v1924_v61  ;;  %v1187_v5 = vpop.f32.mrb[4].mxu1  ;;  %781 = vadd.xlane.f32.xlu0 %v1928_v55 }
 0x242   : > { %v1188_v6 = vpop.f32.mrb[5].mxu1 }
 0x243   : > { %v1189_v7 = vadd.f32 %v1188_v6, %v1187_v5  ;;  %v1933_v8 = vadd.f32 %v692_v4, %v1809_v24 }
 0x245   : > { %v697_v9 = vadd.f32 %v1189_v7, %v1924_v61  ;;  %v1190_v10 = vpop.f32.mrb[6].mxu1  ;;  %783 = vadd.xlane.f32.xlu0 %v1933_v8 }
 0x246   : > { %v1191_v11 = vpop.f32.mrb[7].mxu1 }
 0x247   : > { %v1192_v12 = vadd.f32 %v1191_v11, %v1190_v10  ;;  %v1938_v17 = vadd.f32 %v697_v9, %v1814_v27 }
 0x249   : > { %v702_v13 = vadd.f32 %v1192_v12, %v1924_v61  ;;  %v1193_v14 = vpop.f32.mrb[8].mxu1  ;;  %785 = vadd.xlane.f32.xlu1 %v1938_v17 }
 0x24a   : > { %v1194_v15 = vpop.f32.mrb[9].mxu1 }
 0x24b   : > { %v1195_v16 = vadd.f32 %v1194_v15, %v1193_v14  ;;  %v1943_v24 = vadd.f32 %v702_v13, %v1819_v28 }
 0x24d   : > { %v707_v18 = vadd.f32 %v1195_v16, %v1924_v61  ;;  %v1196_v19 = vpop.f32.mrb[10].mxu1  ;;  %787 = vadd.xlane.f32.xlu1 %v1943_v24 }
 0x24e   : > { %v1197_v20 = vpop.f32.mrb[11].mxu1 }
 0x24f   : > { %v1198_v21 = vadd.f32 %v1197_v20, %v1196_v19  ;;  %v1948_v27 = vadd.f32 %v707_v18, %v1824_v29 }
 0x251   : > { %v712_v22 = vadd.f32 %v1198_v21, %v1924_v61  ;;  %v1199_v23 = vpop.f32.mrb[12].mxu1  ;;  %789 = vadd.xlane.f32.xlu0 %v1948_v27 }
 0x252   : > { %v1200_v25 = vpop.f32.mrb[13].mxu1 }
 0x253   : > { %v1201_v26 = vadd.f32 %v1200_v25, %v1199_v23  ;;  %v1953_v28 = vadd.f32 %v712_v22, %v1829_v30 }
 0x255   : > { %v717_v41 = vadd.f32 %v1201_v26, %v1924_v61  ;;  %v1202_v42 = vpop.f32.mrb[14].mxu1  ;;  %791 = vadd.xlane.f32.xlu1 %v1953_v28 }
 0x256   : > { %v1203_v43 = vpop.f32.mrb[15].mxu1 }
 0x257   : > { %v1204_v44 = vadd.f32 %v1203_v43, %v1202_v42  ;;  %v1958_v29 = vadd.f32 %v717_v41, %v1834_v31 }
 0x259   : > { %v722_v45 = vadd.f32 %v1204_v44, %v1924_v61  ;;  %v1205_v46 = vpop.f32.mrb[16].mxu1  ;;  %793 = vadd.xlane.f32.xlu0 %v1958_v29 }
 0x25a   : > { %v1206_v47 = vpop.f32.mrb[17].mxu1 }
 0x25b   : > { %v1207_v48 = vadd.f32 %v1206_v47, %v1205_v46  ;;  %v1963_v30 = vadd.f32 %v722_v45, %v1839_v32 }
 0x25d   : > { %v727_v49 = vadd.f32 %v1207_v48, %v1924_v61  ;;  %v1208_v50 = vpop.f32.mrb[18].mxu1  ;;  %795 = vadd.xlane.f32.xlu1 %v1963_v30 }
 0x25e   : > { %v1209_v51 = vpop.f32.mrb[19].mxu1 }
 0x25f   : > { %v1210_v52 = vadd.f32 %v1209_v51, %v1208_v50  ;;  %v1968_v31 = vadd.f32 %v727_v49, %v1844_v33 }
 0x261   : > { %v732_v0 = vadd.f32 %v1210_v52, %v1924_v61  ;;  %v1211_v53 = vpop.f32.mrb[20].mxu1  ;;  %797 = vadd.xlane.f32.xlu0 %v1968_v31 }
 0x262   : > { %v1212_v56 = vpop.f32.mrb[21].mxu1 }
 0x263   : > { %v1213_v57 = vadd.f32 %v1212_v56, %v1211_v53  ;;  %v1973_v32 = vadd.f32 %v732_v0, %v1849_v34 }
 0x265   : > { %v737_v58 = vadd.f32 %v1213_v57, %v1924_v61  ;;  %v1214_v59 = vpop.f32.mrb[22].mxu1  ;;  %799 = vadd.xlane.f32.xlu1 %v1973_v32 }
 0x266   : > { %v1215_v60 = vpop.f32.mrb[23].mxu1 }
 0x267   : > { %v1216_v62 = vadd.f32 %v1215_v60, %v1214_v59  ;;  %v1978_v33 = vadd.f32 %v737_v58, %v1854_v35 }
 0x269   : > { %v742_v63 = vadd.f32 %v1216_v62, %v1924_v61  ;;  %v1217_v1 = vpop.f32.mrb[24].mxu1  ;;  %801 = vadd.xlane.f32.xlu0 %v1978_v33 }
 0x26a   : > { %v1218_v54 = vpop.f32.mrb[25].mxu1 }
 0x26b   : > { %v1219_v2 = vadd.f32 %v1218_v54, %v1217_v1  ;;  %v1983_v34 = vadd.f32 %v742_v63, %v1859_v36 }
 0x26d   : > { %v747_v3 = vadd.f32 %v1219_v2, %v1924_v61  ;;  %v1220_v4 = vpop.f32.mrb[26].mxu1  ;;  %803 = vadd.xlane.f32.xlu1 %v1983_v34 }
 0x26e   : > { %v1221_v5 = vpop.f32.mrb[27].mxu1 }
 0x26f   : > { %v1222_v6 = vadd.f32 %v1221_v5, %v1220_v4  ;;  %v1988_v35 = vadd.f32 %v747_v3, %v1864_v37 }
 0x271   : > { %v752_v7 = vadd.f32 %v1222_v6, %v1924_v61  ;;  %v1223_v9 = vpop.f32.mrb[28].mxu1  ;;  %805 = vadd.xlane.f32.xlu0 %v1988_v35 }
 0x272   : > { %v1224_v10 = vpop.f32.mrb[29].mxu1 }
 0x273   : > { %v1225_v11 = vadd.f32 %v1224_v10, %v1223_v9  ;;  %v1993_v36 = vadd.f32 %v752_v7, %v1869_v38 }
 0x275   : > { %v757_v12 = vadd.f32 %v1225_v11, %v1924_v61  ;;  %v1226_v13 = vpop.f32.mrb[30].mxu1  ;;  %807 = vadd.xlane.f32.xlu1 %v1993_v36 }
 0x276   : > { %v1227_v14 = vpop.f32.mrb[31].mxu1 }
 0x277   : > { %v1228_v15 = vadd.f32 %v1227_v14, %v1226_v13  ;;  %v1998_v37 = vadd.f32 %v757_v12, %v1874_v39 }
 0x279   : > { %v762_v16 = vadd.f32 %v1228_v15, %v1924_v61  ;;  %809 = vadd.xlane.f32.xlu0 %v1998_v37 }
 0x27b   : > { %v2003_v18 = vadd.f32 %v762_v16, %v1879_v40 }
 0x27d   : > { %811 = vadd.xlane.f32.xlu1 %v2003_v18 }
 0x2ce   : > { %v782_v38 = vpop.xlane.xlu0 %781 }
 0x2cf   : > { %v814_v19 = vmul.f32 0.0078125, %v782_v38 }
 0x2d1   : > { %v2007_v20 = vsub.f32 %v1928_v55, %v814_v19 }
 0x2d2   : > { %v784_v21 = vpop.xlane.xlu0 %783 }
 0x2d3   : > { %v815_v22 = vmul.f32 0.0078125, %v784_v21  ;;  %v846_v39 = vmul.f32 %v2007_v20, %v2007_v20 }
 0x2d5   : > { %v2012_v23 = vsub.f32 %v1933_v8, %v815_v22  ;;  %862 = vadd.xlane.f32.xlu0 %v846_v39 }
 0x2d6   : > { %v786_v61 = vpop.xlane.xlu1 %785 }
 0x2d7   : > { %v816_v25 = vmul.f32 0.0078125, %v786_v61  ;;  %v847_v40 = vmul.f32 %v2012_v23, %v2012_v23 }
 0x2d9   : > { %v2017_v26 = vsub.f32 %v1938_v17, %v816_v25  ;;  %864 = vadd.xlane.f32.xlu1 %v847_v40 }
 0x2da   : > { %v788_v55 = vpop.xlane.xlu1 %787 }
 0x2db   : > { %v817_v41 = vmul.f32 0.0078125, %v788_v55  ;;  %v848_v42 = vmul.f32 %v2017_v26, %v2017_v26 }
 0x2dd   : > { %v2022_v43 = vsub.f32 %v1943_v24, %v817_v41  ;;  %866 = vadd.xlane.f32.xlu0 %v848_v42 }
 0x2de   : > { %v790_v8 = vpop.xlane.xlu0 %789 }
 0x2df   : > { %v818_v44 = vmul.f32 0.0078125, %v790_v8  ;;  %v849_v45 = vmul.f32 %v2022_v43, %v2022_v43 }
 0x2e1   : > { %v2027_v46 = vsub.f32 %v1948_v27, %v818_v44  ;;  %868 = vadd.xlane.f32.xlu1 %v849_v45  ;;  %v2089_v44 = vld [vmem:[%s2220_s5] ss:$0 sm:$0xff] }
 0x2e2   : > { %v792_v17 = vpop.xlane.xlu1 %791 }
 0x2e3   : > { %v819_v47 = vmul.f32 0.0078125, %v792_v17  ;;  %v850_v48 = vmul.f32 %v2027_v46, %v2027_v46 }
 0x2e5   : > { %v2032_v49 = vsub.f32 %v1953_v28, %v819_v47  ;;  %870 = vadd.xlane.f32.xlu0 %v850_v48  ;;  %v2095_v48 = vld [vmem:[%s2221_s6] ss:$0 sm:$0xff] }
 0x2e6   : > { %v794_v24 = vpop.xlane.xlu0 %793 }
 0x2e7   : > { %v820_v50 = vmul.f32 0.0078125, %v794_v24  ;;  %v851_v51 = vmul.f32 %v2032_v49, %v2032_v49 }
 0x2e9   : > { %v2037_v52 = vsub.f32 %v1958_v29, %v820_v50  ;;  %872 = vadd.xlane.f32.xlu1 %v851_v51 }
 0x2ea   : > { %v796_v27 = vpop.xlane.xlu1 %795 }
 0x2eb   : > { %v821_v0 = vmul.f32 0.0078125, %v796_v27  ;;  %v852_v53 = vmul.f32 %v2037_v52, %v2037_v52 }
 0x2ed   : > { %v2042_v56 = vsub.f32 %v1963_v30, %v821_v0  ;;  %874 = vadd.xlane.f32.xlu0 %v852_v53 }
 0x2ee   : > { %v798_v28 = vpop.xlane.xlu0 %797 }
 0x2ef   : > { %v822_v57 = vmul.f32 0.0078125, %v798_v28  ;;  %v853_v58 = vmul.f32 %v2042_v56, %v2042_v56 }
 0x2f1   : > { %v2047_v59 = vsub.f32 %v1968_v31, %v822_v57  ;;  %876 = vadd.xlane.f32.xlu1 %v853_v58 }
 0x2f2   : > { %v800_v29 = vpop.xlane.xlu1 %799 }
 0x2f3   : > { %v823_v60 = vmul.f32 0.0078125, %v800_v29  ;;  %v854_v62 = vmul.f32 %v2047_v59, %v2047_v59 }
 0x2f5   : > { %v2052_v63 = vsub.f32 %v1973_v32, %v823_v60  ;;  %878 = vadd.xlane.f32.xlu0 %v854_v62 }
 0x2f6   : > { %v802_v30 = vpop.xlane.xlu0 %801 }
 0x2f7   : > { %v824_v1 = vmul.f32 0.0078125, %v802_v30  ;;  %v855_v54 = vmul.f32 %v2052_v63, %v2052_v63 }
 0x2f9   : > { %v2057_v2 = vsub.f32 %v1978_v33, %v824_v1  ;;  %880 = vadd.xlane.f32.xlu1 %v855_v54 }
 0x2fa   : > { %v804_v31 = vpop.xlane.xlu1 %803 }
 0x2fb   : > { %v825_v3 = vmul.f32 0.0078125, %v804_v31  ;;  %v856_v4 = vmul.f32 %v2057_v2, %v2057_v2 }
 0x2fd   : > { %v2062_v5 = vsub.f32 %v1983_v34, %v825_v3  ;;  %882 = vadd.xlane.f32.xlu0 %v856_v4 }
 0x2fe   : > { %v806_v32 = vpop.xlane.xlu0 %805 }
 0x2ff   : > { %v826_v6 = vmul.f32 0.0078125, %v806_v32  ;;  %v857_v7 = vmul.f32 %v2062_v5, %v2062_v5 }
 0x301   : > { %v2067_v9 = vsub.f32 %v1988_v35, %v826_v6  ;;  %884 = vadd.xlane.f32.xlu1 %v857_v7 }
 0x302   : > { %v808_v33 = vpop.xlane.xlu1 %807 }
 0x303   : > { %v827_v10 = vmul.f32 0.0078125, %v808_v33  ;;  %v858_v11 = vmul.f32 %v2067_v9, %v2067_v9 }
 0x305   : > { %v2072_v12 = vsub.f32 %v1993_v36, %v827_v10  ;;  %886 = vadd.xlane.f32.xlu0 %v858_v11 }
 0x306   : > { %v810_v34 = vpop.xlane.xlu0 %809 }
 0x307   : > { %v828_v13 = vmul.f32 0.0078125, %v810_v34  ;;  %v859_v14 = vmul.f32 %v2072_v12, %v2072_v12 }
 0x309   : > { %v2077_v15 = vsub.f32 %v1998_v37, %v828_v13  ;;  %888 = vadd.xlane.f32.xlu1 %v859_v14 }
 0x30a   : > { %v812_v35 = vpop.xlane.xlu1 %811 }
 0x30b   : > { %v829_v16 = vmul.f32 0.0078125, %v812_v35  ;;  %v860_v38 = vmul.f32 %v2077_v15, %v2077_v15 }
 0x30d   : > { %v2082_v19 = vsub.f32 %v2003_v18, %v829_v16  ;;  %890 = vadd.xlane.f32.xlu0 %v860_v38 }
 0x30f   : > { %v861_v36 = vmul.f32 %v2082_v19, %v2082_v19 }
 0x311   : > { %892 = vadd.xlane.f32.xlu1 %v861_v36 }
 0x362   : > { %v863_v21 = vpop.xlane.xlu0 %862 }
 0x363   : > { %v894_v22 = vmul.f32 0.0078125, %v863_v21 }
 0x365   : > { %v910_v39 = vadd.f32 1e-06, %v894_v22 }
 0x366   : > { %v865_v61 = vpop.xlane.xlu1 %864 }
 0x367   : > { %1367 = vrsqrt.f32 %v910_v39  ;;  %v895_v37 = vmul.f32 0.0078125, %v865_v61 }
 0x369   : > { %v911_v25 = vadd.f32 1e-06, %v895_v37 }
 0x36a   : > { %v867_v40 = vpop.xlane.xlu0 %866 }
 0x36b   : > { %1369 = vrsqrt.f32 %v911_v25  ;;  %v896_v55 = vmul.f32 0.0078125, %v867_v40 }
 0x36d   : > { %v912_v41 = vadd.f32 1e-06, %v896_v55 }
 0x36e   : > { %v869_v42 = vpop.xlane.xlu1 %868 }
 0x36f   : > { %1371 = vrsqrt.f32 %v912_v41  ;;  %v897_v18 = vmul.f32 0.0078125, %v869_v42 }
 0x371   : > { %v1368_v8 = vpop.eup %1367  ;;  %v913_v45 = vadd.f32 1e-06, %v897_v18 }
 0x372   : > { %v942_v17 = vmul.f32 %v1368_v8, %v2007_v20  ;;  %v871_v47 = vpop.xlane.xlu0 %870 }
 0x373   : > { %1373 = vrsqrt.f32 %v913_v45  ;;  %v898_v24 = vmul.f32 0.0078125, %v871_v47 }
 0x374   : > { %v965_v50 = vmul.f32 %v2089_v44, %v942_v17 }
 0x375   : > { %v1370_v51 = vpop.eup %1369  ;;  %v914_v27 = vadd.f32 1e-06, %v898_v24 }
 0x376   : > { %v988_v0 = vadd.f32 %v2095_v48, %v965_v50  ;;  %v943_v53 = vmul.f32 %v1370_v51, %v2012_v23  ;;  %v873_v28 = vpop.xlane.xlu1 %872 }
 0x377   : > { %1375 = vrsqrt.f32 %v914_v27  ;;  %v899_v57 = vmul.f32 0.0078125, %v873_v28 }
 0x378   : > { %1004 = vst [vmem:[%s2102_s21] sm:$0xff] %v988_v0  ;;  %v966_v20 = vmul.f32 %v2089_v44, %v943_v53 }
 0x379   : > { %v1372_v58 = vpop.eup %1371  ;;  %v915_v29 = vadd.f32 1e-06, %v899_v57 }
 0x37a   : > { %v989_v60 = vadd.f32 %v2095_v48, %v966_v20  ;;  %v944_v62 = vmul.f32 %v1372_v58, %v2017_v26  ;;  %v875_v30 = vpop.xlane.xlu0 %874 }
 0x37b   : > { %1377 = vrsqrt.f32 %v915_v29  ;;  %v900_v23 = vmul.f32 0.0078125, %v875_v30 }
 0x37c   : > { %1005 = vst [vmem:[%s2102_s21 + $0x8] sm:$0xff] %v989_v60  ;;  %v967_v1 = vmul.f32 %v2089_v44, %v944_v62 }
 0x37d   : > { %v1374_v54 = vpop.eup %1373  ;;  %v916_v31 = vadd.f32 1e-06, %v900_v23 }
 0x37e   : > { %v990_v3 = vadd.f32 %v2095_v48, %v967_v1  ;;  %v945_v4 = vmul.f32 %v1374_v54, %v2022_v43  ;;  %v877_v32 = vpop.xlane.xlu1 %876 }
 0x37f   : > { %1379 = vrsqrt.f32 %v916_v31  ;;  %v901_v6 = vmul.f32 0.0078125, %v877_v32 }
 0x380   : > { %1006 = vst [vmem:[%s2102_s21 + $0x10] sm:$0xff] %v990_v3  ;;  %v968_v7 = vmul.f32 %v2089_v44, %v945_v4 }
 0x381   : > { %v1376_v26 = vpop.eup %1375  ;;  %v917_v33 = vadd.f32 1e-06, %v901_v6 }
 0x382   : > { %v991_v10 = vadd.f32 %v2095_v48, %v968_v7  ;;  %v946_v11 = vmul.f32 %v1376_v26, %v2027_v46  ;;  %v879_v34 = vpop.xlane.xlu0 %878 }
 0x383   : > { %1381 = vrsqrt.f32 %v917_v33  ;;  %v902_v13 = vmul.f32 0.0078125, %v879_v34 }
 0x384   : > { %1007 = vst [vmem:[%s2102_s21 + $0x18] sm:$0xff] %v991_v10  ;;  %v969_v14 = vmul.f32 %v2089_v44, %v946_v11 }
 0x385   : > { %v1378_v43 = vpop.eup %1377  ;;  %v918_v35 = vadd.f32 1e-06, %v902_v13 }
 0x386   : > { %v992_v16 = vadd.f32 %v2095_v48, %v969_v14  ;;  %v947_v38 = vmul.f32 %v1378_v43, %v2032_v49  ;;  %v881_v36 = vpop.xlane.xlu1 %880 }
 0x387   : > { %1383 = vrsqrt.f32 %v918_v35  ;;  %v903_v21 = vmul.f32 0.0078125, %v881_v36 }
 0x388   : > { %1008 = vst [vmem:[%s2102_s21 + $0x20] sm:$0xff] %v992_v16  ;;  %v970_v22 = vmul.f32 %v2089_v44, %v947_v38 }
 0x389   : > { %v1380_v46 = vpop.eup %1379  ;;  %v919_v39 = vadd.f32 1e-06, %v903_v21 }
 0x38a   : > { %v993_v61 = vadd.f32 %v2095_v48, %v970_v22  ;;  %v948_v37 = vmul.f32 %v1380_v46, %v2037_v52  ;;  %v883_v25 = vpop.xlane.xlu0 %882 }
 0x38b   : > { %1385 = vrsqrt.f32 %v919_v39  ;;  %v904_v40 = vmul.f32 0.0078125, %v883_v25 }
 0x38c   : > { %1009 = vst [vmem:[%s2102_s21 + $0x28] sm:$0xff] %v993_v61  ;;  %v971_v55 = vmul.f32 %v2089_v44, %v948_v37 }
 0x38d   : > { %v1382_v49 = vpop.eup %1381  ;;  %v920_v41 = vadd.f32 1e-06, %v904_v40 }
 0x38e   : > { %v994_v42 = vadd.f32 %v2095_v48, %v971_v55  ;;  %v949_v18 = vmul.f32 %v1382_v49, %v2042_v56  ;;  %v885_v8 = vpop.xlane.xlu1 %884 }
 0x38f   : > { %1387 = vrsqrt.f32 %v920_v41  ;;  %v905_v45 = vmul.f32 0.0078125, %v885_v8 }
 0x390   : > { %1010 = vst [vmem:[%s2102_s21 + $0x30] sm:$0xff] %v994_v42  ;;  %v972_v17 = vmul.f32 %v2089_v44, %v949_v18 }
 0x391   : > { %v1384_v52 = vpop.eup %1383  ;;  %v921_v47 = vadd.f32 1e-06, %v905_v45 }
 0x392   : > { %v995_v24 = vadd.f32 %v2095_v48, %v972_v17  ;;  %v950_v50 = vmul.f32 %v1384_v52, %v2047_v59  ;;  %v887_v51 = vpop.xlane.xlu0 %886 }
 0x393   : > { %1389 = vrsqrt.f32 %v921_v47  ;;  %v906_v27 = vmul.f32 0.0078125, %v887_v51 }
 0x394   : > { %1011 = vst [vmem:[%s2102_s21 + $0x38] sm:$0xff] %v995_v24  ;;  %v973_v0 = vmul.f32 %v2089_v44, %v950_v50 }
 0x395   : > { %v1386_v56 = vpop.eup %1385  ;;  %v922_v53 = vadd.f32 1e-06, %v906_v27 }
 0x396   : > { %v996_v28 = vadd.f32 %v2095_v48, %v973_v0  ;;  %v951_v57 = vmul.f32 %v1386_v56, %v2052_v63  ;;  %v889_v20 = vpop.xlane.xlu1 %888 }
 0x397   : > { %1391 = vrsqrt.f32 %v922_v53  ;;  %v907_v58 = vmul.f32 0.0078125, %v889_v20 }
 0x398   : > { %1012 = vst [vmem:[%s2102_s21 + $0x40] sm:$0xff] %v996_v28  ;;  %v974_v29 = vmul.f32 %v2089_v44, %v951_v57 }
 0x399   : > { %v1388_v59 = vpop.eup %1387  ;;  %v923_v60 = vadd.f32 1e-06, %v907_v58 }
 0x39a   : > { %v997_v62 = vadd.f32 %v2095_v48, %v974_v29  ;;  %v952_v30 = vmul.f32 %v1388_v59, %v2057_v2  ;;  %v891_v23 = vpop.xlane.xlu0 %890 }
 0x39b   : > { %1393 = vrsqrt.f32 %v923_v60  ;;  %v908_v1 = vmul.f32 0.0078125, %v891_v23 }
 0x39c   : > { %1013 = vst [vmem:[%s2102_s21 + $0x48] sm:$0xff] %v997_v62  ;;  %v975_v63 = vmul.f32 %v2089_v44, %v952_v30 }
 0x39d   : > { %v1390_v54 = vpop.eup %1389  ;;  %v924_v31 = vadd.f32 1e-06, %v908_v1 }
 0x39e   : > { %v998_v3 = vadd.f32 %v2095_v48, %v975_v63  ;;  %v953_v4 = vmul.f32 %v1390_v54, %v2062_v5  ;;  %v893_v32 = vpop.xlane.xlu1 %892 }
 0x39f   : > { %1395 = vrsqrt.f32 %v924_v31  ;;  %v909_v6 = vmul.f32 0.0078125, %v893_v32 }
 0x3a0   : > { %1014 = vst [vmem:[%s2102_s21 + $0x50] sm:$0xff] %v998_v3  ;;  %v976_v2 = vmul.f32 %v2089_v44, %v953_v4 }
 0x3a1   : > { %v1392_v7 = vpop.eup %1391  ;;  %v925_v26 = vadd.f32 1e-06, %v909_v6 }
 0x3a2   : > { %v999_v33 = vadd.f32 %v2095_v48, %v976_v2  ;;  %v954_v10 = vmul.f32 %v1392_v7, %v2067_v9 }
 0x3a3   : > { %1397 = vrsqrt.f32 %v925_v26 }
 0x3a4   : > { %1015 = vst [vmem:[%s2102_s21 + $0x58] sm:$0xff] %v999_v33  ;;  %v977_v5 = vmul.f32 %v2089_v44, %v954_v10 }
 0x3a5   : > { %v1394_v11 = vpop.eup %1393 }
 0x3a6   : > { %v1000_v34 = vadd.f32 %v2095_v48, %v977_v5  ;;  %v955_v13 = vmul.f32 %v1394_v11, %v2072_v12 }
 0x3a8   : > { %1016 = vst [vmem:[%s2102_s21 + $0x60] sm:$0xff] %v1000_v34  ;;  %v978_v14 = vmul.f32 %v2089_v44, %v955_v13 }
 0x3a9   : > { %v1396_v43 = vpop.eup %1395 }
 0x3aa   : > { %v1001_v9 = vadd.f32 %v2095_v48, %v978_v14  ;;  %v956_v35 = vmul.f32 %v1396_v43, %v2077_v15 }
 0x3ac   : > { %1017 = vst [vmem:[%s2102_s21 + $0x68] sm:$0xff] %v1001_v9  ;;  %v979_v16 = vmul.f32 %v2089_v44, %v956_v35 }
 0x3ad   : > { %v1398_v38 = vpop.eup %1397 }
 0x3ae   : > { %v1002_v36 = vadd.f32 %v2095_v48, %v979_v16  ;;  %v957_v21 = vmul.f32 %v1398_v38, %v2082_v19 }
 0x3b0   : > { %1018 = vst [vmem:[%s2102_s21 + $0x70] sm:$0xff] %v1002_v36  ;;  %v980_v12 = vmul.f32 %v2089_v44, %v957_v21 }
 0x3b2   : > { %v1003_v15 = vadd.f32 %v2095_v48, %v980_v12 }
 0x3b4   : > { %1019 = vst [vmem:[%s2102_s21 + $0x78] sm:$0xff] %v1003_v15 }
 0x3b5   : > { %1498 = shalt.err (!%p1495_p2)
}
 0x3b6   : > { %s1499_s16 = scalar_lea.hbm %s2167_s30, 2048  ;;  %s1503_s21 = scalar_lea.hbm %s2222_s7, 4096 }
 0x3b7   : > { %p1500_p13 = scmp.ne.s32.totalorder %s2167_s30, %s1499_s16  ;;  %p1504_p4 = scmp.lt.u32.totalorder %s2167_s30, %s2222_s7 }
 0x3b8   : > { %p1505_p7 = scmp.lt.u32.totalorder %s1503_s21, %s1499_s16  ;;  %p1507_p11 = scmp.lt.u32.totalorder %s1499_s16, %s2167_s30 }
 0x3b9   : > { %p1501_p6 = pnand %p1500_p13, %p2238_p0 }
 0x3ba   : > { %p1506_p8 = por %p1505_p7, %p1504_p4 }
 0x3bb   : > { %p1502_p10 = pneg %p1501_p6 }
 0x3bc   : > { %p1508_p1 = por %p1507_p11, %p1506_p8 }
 0x3be   : > { %p1509_p3 = pnand %p1508_p1, %p1502_p10 }
 0x3c0   : > { %1512 = shalt.err (!%p1509_p3)
}
 0x3c1   : > { %s1566_s15 = smov 128   ;;  %s1567_s23 = smov 8  }
 0x3c2   : > { %1303 = dma.vmem_to_hbm [thread:$0]  (%p2238_p0), %s2169_s29, 2048, %s2167_s30, %s1021_s9, %s1566_s15, %s1566_s15, %s1567_s23  }
 0x3c3 PF: > { %s1049_s28 = sand.u32 1, %s1543_s24   ;;  %p2239_p5 = scmp.ne.s32.totalorder %s2228_s8, 0 }
 0x3c4   : > { %p2240_p9 = scmp.ge.s32.totalorder %s1555_s27, 2  ;;  %s1050_s11 = scalar_lea.sflag [#allocation4], %s1049_s28 }
 0x3c6   : > { %p1317_p12 = pnand %p2240_p9, %p2239_p5 }
 0x3c8   : > { %1538 = dma.done.wait (!%p1317_p12), %s1050_s11, 2048  }
 0x3c9   : > { %1540 = vsyncadd (!%p1317_p12), %s1050_s11, 4294965248  ;;  %p21_p2 = scmp.ge.s32.totalorder %s1721_s13, 4   ;;  %s2241_s24 = smov %s1547_s25 }
 0x3ca   : > { %s2242_s25 = smov %s1551_s26  ;;  %s2243_s26 = smov %s1730_s17 }
 0x3cb   : > { %s2244_s27 = smov %s1721_s13  ;;  %23 = sbr.rel (!%p21_p2) target bundleno = 6 (0x6), region = 101 }
 0x3d2   :  { %1055 = vsyncpa [#allocation3], 1 }
 0x3d3   :  { %1057 = vsyncpa [#allocation3 + $0x1], 1 }
 0x3d4   :  { %1058 = vsyncpa [#allocation6], 1 }
 0x3d5   :  { %1059 = vsyncpa [#allocation4], 1 }
 0x3d6   :  { %1061 = vsyncpa [#allocation4 + $0x1], 1 }

</bundles_post_ra>
